<compile_context>
chip_gen: v6e
topology: v6e:2x2x1
jax: 0.10.0
libtpu: 0.0.40
codegen_flags: <defaults>
</compile_context>

<pallas_src>
import functools
import numpy as np
import jax
import jax.numpy as jnp
from jax.experimental import pallas as pl
from jax.experimental.pallas import tpu as pltpu


def _round_up(x, m):
    return ((x + m - 1) // m) * m


def prober_kernel(e_ref, w1_ref, b1_ref, w2_ref, b2_ref, w3_ref, b3_ref, o_ref,
                  *, compute_dtype):
    # Cast the f32 input tile to the compute dtype HERE (VPU cast, hidden under
    # DMA) rather than in the wrapper (which would add an extra HBM pass on e).
    x = e_ref[...].astype(compute_dtype)
    # Layer 1: Linear + ReLU (MXU dot, f32 accumulation; bias/ReLU in f32 -- v5e
    # has no bf16 VPU).
    h1 = jnp.dot(x, w1_ref[...], preferred_element_type=jnp.float32)
    h1 = jnp.maximum(h1 + b1_ref[...], 0.0)
    # Layer 2: Linear + ReLU.
    h2 = jnp.dot(h1.astype(compute_dtype), w2_ref[...],
                 preferred_element_type=jnp.float32)
    h2 = jnp.maximum(h2 + b2_ref[...], 0.0)
    # Layer 3: Linear (no activation).
    out = jnp.dot(h2.astype(compute_dtype), w3_ref[...],
                  preferred_element_type=jnp.float32)
    out = out + b3_ref[...]
    # out_dim (4) < 128 lanes => masked store; accepted deliberately (padding the
    # HBM output to 128 lanes would write 32x more bytes on a mem-bound kernel).
    o_ref[...] = out.astype(o_ref.dtype)


def prober_forward(e, params, *, block_batch=2048, compute_dtype=jnp.bfloat16,
                   out_dtype=None):
    """e: (B, embedding) float32.  params: dict of f32 weights [in,out] / biases [1,out]."""
    B, E = e.shape
    H1 = params["w1"].shape[1]
    H2 = params["w2"].shape[1]
    out_dim = params["w3"].shape[1]
    if out_dtype is None:
        out_dtype = compute_dtype

    out_isz = jnp.dtype(out_dtype).itemsize
    cd_isz = jnp.dtype(compute_dtype).itemsize

    # ---- batch tile selection ----------------------------------------------
    block_batch = max(8, _round_up(block_batch, 8))
    tm = min(block_batch, _round_up(B, 8))
    # Per-row VMEM footprint (everything lane-padded to 128 in VMEM):
    #   e block f32 x2 (double-buffered), out block x2, f32 h1/h2/out temps,
    #   compute-dtype copies of h1/h2.
    per_row_bytes = 128 * (2 * 4 + 2 * out_isz + 3 * 4 + 2 * cd_isz)
    tm_cap = max(8, (((24 << 20) // per_row_bytes) // 8) * 8)
    tm = min(tm, tm_cap)
    # v7x megacore: if the grid collapses to one step at a non-trivial B, split
    # it in two so the "parallel" axis can feed both TensorCores.
    if pl.cdiv(B, tm) < 2 and B >= 512:
        tm = min(tm, _round_up(pl.cdiv(B, 2), 8))
    grid = (pl.cdiv(B, tm),)

    # Weights/biases are tiny (few KiB): cast once in the wrapper; VMEM-resident
    # inside the kernel via a constant index_map. Biases stay f32.
    w1 = params["w1"].astype(compute_dtype)
    w2 = params["w2"].astype(compute_dtype)
    w3 = params["w3"].astype(compute_dtype)
    b1, b2, b3 = params["b1"], params["b2"], params["b3"]

    resident = lambda i: (0, 0)   # same block every step -> stays in VMEM
    flops = 2 * B * (E * H1 + H1 * H2 + H2 * out_dim)
    bytes_accessed = (B * E * 4 + B * out_dim * out_isz
                      + (E * H1 + H1 * H2 + H2 * out_dim) * cd_isz
                      + (H1 + H2 + out_dim) * 4)

    out = pl.pallas_call(
        functools.partial(prober_kernel, compute_dtype=compute_dtype),
        out_shape=jax.ShapeDtypeStruct((B, out_dim), out_dtype),
        grid=grid,
        in_specs=[
            pl.BlockSpec((tm, E), lambda i: (i, 0)),     # batch tile of e (f32)
            pl.BlockSpec((E, H1), resident),
            pl.BlockSpec((1, H1), resident),
            pl.BlockSpec((H1, H2), resident),
            pl.BlockSpec((1, H2), resident),
            pl.BlockSpec((H2, out_dim), resident),
            pl.BlockSpec((1, out_dim), resident),
        ],
        out_specs=pl.BlockSpec((tm, out_dim), lambda i: (i, 0)),
        compiler_params=pltpu.CompilerParams(
            dimension_semantics=("parallel",),           # v7x: shard batch over 2 TCs
            vmem_limit_bytes=32 * 1024 * 1024,
        ),
        cost_estimate=pl.CostEstimate(
            flops=flops, transcendentals=0, bytes_accessed=bytes_accessed),
    )(e, w1, b1, w2, b2, w3, b3)
    return out


def init_prober_params(key, embedding, arch, output_shape):
    """Deterministic init matching nn.Linear default (uniform +/- 1/sqrt(fan_in))."""
    output_dim = int(np.prod(output_shape))
    arch_list = list(map(int, arch.split("-"))) if arch != "" else []
    f = [embedding] + arch_list + [output_dim]
    assert len(f) == 4, "this script is specialized to a 3-layer prober"
    params = {}
    names = [("w1", "b1"), ("w2", "b2"), ("w3", "b3")]
    for i, (wn, bn) in enumerate(names):
        fan_in, fan_out = f[i], f[i + 1]
        key, kw, kb = jax.random.split(key, 3)
        bound = 1.0 / np.sqrt(fan_in)
        # stored as [in, out] (transpose of PyTorch's [out, in]); semantics identical.
        params[wn] = jax.random.uniform(kw, (fan_in, fan_out), jnp.float32,
                                        minval=-bound, maxval=bound)
        params[bn] = jax.random.uniform(kb, (1, fan_out), jnp.float32,
                                        minval=-bound, maxval=bound)
    return params


def prober_reference(e, params, compute_dtype=jnp.float32):
    """Pure-JAX reference of the same MLP (same dtype policy as the kernel)."""
    w1 = params["w1"].astype(compute_dtype)
    w2 = params["w2"].astype(compute_dtype)
    w3 = params["w3"].astype(compute_dtype)
    h = jnp.dot(e.astype(compute_dtype), w1, preferred_element_type=jnp.float32)
    h = jnp.maximum(h + params["b1"], 0.0)
    h = jnp.dot(h.astype(compute_dtype), w2, preferred_element_type=jnp.float32)
    h = jnp.maximum(h + params["b2"], 0.0)
    out = jnp.dot(h.astype(compute_dtype), w3, preferred_element_type=jnp.float32)
    return out + params["b3"]


if __name__ == "__main__":
    embedding = 32
    arch = "64-32"
    output_shape = [2, 2]   # output_dim = 4
    out_dim = int(np.prod(output_shape))

    key = jax.random.PRNGKey(0)
    key, k1, k2, k3 = jax.random.split(key, 4)
    params = init_prober_params(key, embedding, arch, output_shape)

    # 1) Tiny batch, strict f32 semantics (single-step grid).
    e8 = jax.random.normal(k1, (8, embedding), jnp.float32)
    out = jax.block_until_ready(prober_forward(e8, params, compute_dtype=jnp.float32))
    ref = prober_reference(e8, params, jnp.float32)
    assert out.shape == (8, out_dim) and out.dtype == jnp.float32
    np.testing.assert_allclose(np.asarray(out), np.asarray(ref), rtol=1e-5, atol=1e-5)

    # 2) Ragged multi-step grid (B=100, tm=64 -> 2 steps, masked tail), f32.
    e100 = jax.random.normal(k2, (100, embedding), jnp.float32)
    out = jax.block_until_ready(
        prober_forward(e100, params, block_batch=64, compute_dtype=jnp.float32))
    ref = prober_reference(e100, params, jnp.float32)
    assert out.shape == (100, out_dim)
    np.testing.assert_allclose(np.asarray(out), np.asarray(ref), rtol=1e-5, atol=1e-5)

    # 3) B large enough to trigger the 2-way megacore split; default bf16
    #    compute/output path (f32 input at the HBM boundary, cast in-kernel).
    e600 = jax.random.normal(k3, (600, embedding), jnp.float32)
    out_bf16 = jax.block_until_ready(prober_forward(e600, params))
    assert out_bf16.shape == (600, out_dim) and out_bf16.dtype == jnp.bfloat16
    ref_f32 = prober_reference(e600, params, jnp.float32)
    ref_bf16 = prober_reference(e600, params, jnp.bfloat16).astype(jnp.bfloat16)
    np.testing.assert_allclose(np.asarray(out_bf16.astype(jnp.float32)),
                               np.asarray(ref_bf16.astype(jnp.float32)),
                               rtol=2e-2, atol=2e-2)
    # Sanity: bf16 path stays close to exact f32 math.
    np.testing.assert_allclose(np.asarray(out_bf16.astype(jnp.float32)),
                               np.asarray(ref_f32), rtol=6e-2, atol=6e-2)

    print("KERNEL_OK")
</pallas_src>

<mosaic_0001>
module attributes {stable_mosaic.version = 11 : i64} {
  func.func @prober_kernel(%arg0: i32, %arg1: memref<8x32xf32, #tpu.memory_space<vmem>>, %arg2: memref<32x64xf32, #tpu.memory_space<vmem>>, %arg3: memref<1x64xf32, #tpu.memory_space<vmem>>, %arg4: memref<64x32xf32, #tpu.memory_space<vmem>>, %arg5: memref<1x32xf32, #tpu.memory_space<vmem>>, %arg6: memref<32x4xf32, #tpu.memory_space<vmem>>, %arg7: memref<1x4xf32, #tpu.memory_space<vmem>>, %arg8: memref<8x4xf32, #tpu.memory_space<vmem>>) attributes {dimension_semantics = [#tpu.dimension_semantics<parallel>], iteration_bounds = array<i64: 1>, scalar_prefetch = 0 : i64, scratch_operands = 0 : i64, tpu.core_type = #tpu.core_type<tc>, window_params = [{transform_indices = @transform_0, window_bounds = array<i64: 8, 32>}, {pipeline_mode = #tpu.pipeline_mode<synchronous>, transform_indices = @transform_1, window_bounds = array<i64: 32, 64>}, {pipeline_mode = #tpu.pipeline_mode<synchronous>, transform_indices = @transform_2, window_bounds = array<i64: 1, 64>}, {pipeline_mode = #tpu.pipeline_mode<synchronous>, transform_indices = @transform_3, window_bounds = array<i64: 64, 32>}, {pipeline_mode = #tpu.pipeline_mode<synchronous>, transform_indices = @transform_4, window_bounds = array<i64: 1, 32>}, {pipeline_mode = #tpu.pipeline_mode<synchronous>, transform_indices = @transform_5, window_bounds = array<i64: 32, 4>}, {pipeline_mode = #tpu.pipeline_mode<synchronous>, transform_indices = @transform_6, window_bounds = array<i64: 1, 4>}, {transform_indices = @transform_7, window_bounds = array<i64: 8, 4>}]} {
    %c0 = arith.constant 0 : index
    %c0_0 = arith.constant 0 : index
    %0 = vector.load %arg1[%c0, %c0_0] : memref<8x32xf32, #tpu.memory_space<vmem>>, vector<8x32xf32>
    %c0_1 = arith.constant 0 : index
    %c0_2 = arith.constant 0 : index
    %1 = vector.load %arg2[%c0_1, %c0_2] : memref<32x64xf32, #tpu.memory_space<vmem>>, vector<32x64xf32>
    %cst = arith.constant dense<0.000000e+00> : vector<8x64xf32>
    %2 = tpu.matmul %0, %1, %cst {dimension_numbers = #tpu.dot_dimension_numbers<[1], [0], [0], [1], [0, 0, 1, 1], [], []>} : vector<8x32xf32>, vector<32x64xf32>, vector<8x64xf32> -> vector<8x64xf32>
    %c0_3 = arith.constant 0 : index
    %c0_4 = arith.constant 0 : index
    %3 = vector.load %arg3[%c0_3, %c0_4] : memref<1x64xf32, #tpu.memory_space<vmem>>, vector<1x64xf32>
    %4 = vector.broadcast %3 : vector<1x64xf32> to vector<8x64xf32>
    %5 = arith.addf %2, %4 : vector<8x64xf32>
    %cst_5 = arith.constant 0.000000e+00 : f32
    %6 = vector.broadcast %cst_5 : f32 to vector<8x64xf32>
    %7 = arith.maximumf %5, %6 : vector<8x64xf32>
    %c0_6 = arith.constant 0 : index
    %c0_7 = arith.constant 0 : index
    %8 = vector.load %arg4[%c0_6, %c0_7] : memref<64x32xf32, #tpu.memory_space<vmem>>, vector<64x32xf32>
    %cst_8 = arith.constant dense<0.000000e+00> : vector<8x32xf32>
    %9 = tpu.matmul %7, %8, %cst_8 {dimension_numbers = #tpu.dot_dimension_numbers<[1], [0], [0], [1], [0, 0, 1, 1], [], []>} : vector<8x64xf32>, vector<64x32xf32>, vector<8x32xf32> -> vector<8x32xf32>
    %c0_9 = arith.constant 0 : index
    %c0_10 = arith.constant 0 : index
    %10 = vector.load %arg5[%c0_9, %c0_10] : memref<1x32xf32, #tpu.memory_space<vmem>>, vector<1x32xf32>
    %11 = vector.broadcast %10 : vector<1x32xf32> to vector<8x32xf32>
    %12 = arith.addf %9, %11 : vector<8x32xf32>
    %cst_11 = arith.constant 0.000000e+00 : f32
    %13 = vector.broadcast %cst_11 : f32 to vector<8x32xf32>
    %14 = arith.maximumf %12, %13 : vector<8x32xf32>
    %c0_12 = arith.constant 0 : index
    %c0_13 = arith.constant 0 : index
    %15 = vector.load %arg6[%c0_12, %c0_13] : memref<32x4xf32, #tpu.memory_space<vmem>>, vector<32x4xf32>
    %cst_14 = arith.constant dense<0.000000e+00> : vector<8x4xf32>
    %16 = tpu.matmul %14, %15, %cst_14 {dimension_numbers = #tpu.dot_dimension_numbers<[1], [0], [0], [1], [0, 0, 1, 1], [], []>} : vector<8x32xf32>, vector<32x4xf32>, vector<8x4xf32> -> vector<8x4xf32>
    %c0_15 = arith.constant 0 : index
    %c0_16 = arith.constant 0 : index
    %17 = vector.load %arg7[%c0_15, %c0_16] : memref<1x4xf32, #tpu.memory_space<vmem>>, vector<1x4xf32>
    %18 = vector.broadcast %17 : vector<1x4xf32> to vector<8x4xf32>
    %19 = arith.addf %16, %18 : vector<8x4xf32>
    %c0_17 = arith.constant 0 : index
    %c0_18 = arith.constant 0 : index
    %20 = vector.load %arg8[%c0_17, %c0_18] : memref<8x4xf32, #tpu.memory_space<vmem>>, vector<8x4xf32>
    tpu.vector_store %arg8[%c0_17, %c0_18], %19 {strides = array<i32>} : memref<8x4xf32, #tpu.memory_space<vmem>>, vector<8x4xf32>,
    return
  }
  func.func @transform_0(%arg0: i32) -> (i32, i32) {
    %c0_i32 = arith.constant 0 : i32
    %c0_i32_0 = arith.constant 0 : i32
    return %arg0, %c0_i32 : i32, i32
  }
  func.func @transform_1(%arg0: i32) -> (i32, i32) {
    %c0_i32 = arith.constant 0 : i32
    %c0_i32_0 = arith.constant 0 : i32
    %c0_i32_1 = arith.constant 0 : i32
    return %c0_i32, %c0_i32_0 : i32, i32
  }
  func.func @transform_2(%arg0: i32) -> (i32, i32) {
    %c0_i32 = arith.constant 0 : i32
    %c0_i32_0 = arith.constant 0 : i32
    %c0_i32_1 = arith.constant 0 : i32
    return %c0_i32, %c0_i32_0 : i32, i32
  }
  func.func @transform_3(%arg0: i32) -> (i32, i32) {
    %c0_i32 = arith.constant 0 : i32
    %c0_i32_0 = arith.constant 0 : i32
    %c0_i32_1 = arith.constant 0 : i32
    return %c0_i32, %c0_i32_0 : i32, i32
  }
  func.func @transform_4(%arg0: i32) -> (i32, i32) {
    %c0_i32 = arith.constant 0 : i32
    %c0_i32_0 = arith.constant 0 : i32
    %c0_i32_1 = arith.constant 0 : i32
    return %c0_i32, %c0_i32_0 : i32, i32
  }
  func.func @transform_5(%arg0: i32) -> (i32, i32) {
    %c0_i32 = arith.constant 0 : i32
    %c0_i32_0 = arith.constant 0 : i32
    %c0_i32_1 = arith.constant 0 : i32
    return %c0_i32, %c0_i32_0 : i32, i32
  }
  func.func @transform_6(%arg0: i32) -> (i32, i32) {
    %c0_i32 = arith.constant 0 : i32
    %c0_i32_0 = arith.constant 0 : i32
    %c0_i32_1 = arith.constant 0 : i32
    return %c0_i32, %c0_i32_0 : i32, i32
  }
  func.func @transform_7(%arg0: i32) -> (i32, i32) {
    %c0_i32 = arith.constant 0 : i32
    %c0_i32_0 = arith.constant 0 : i32
    return %arg0, %c0_i32 : i32, i32
  }
}

</mosaic_0001>

<bundles_post_ra>
// kernel: tpu_custom_call.1
= control target key start
LH: loop header
LB: loop body
LE: loop exit
PB: predicated region body
PF: predicated region fallthrough
CT: control target
= control target key end

     0   :  { %v361_v0 = vmov 0.0   ;;  %vm362_vm0 = vmmov 0   ;;  %vm38_vm1 = vcmask 261120   ;;  %vm128_vm2 = vcmask 523264   ;;  %s471_s1 = inlined_call_operand.vmem [shape: f32[32,64], index: 1, kind: input, shape index: {}]   ;;  %s472_s3 = inlined_call_operand.vmem [shape: f32[64,32], index: 3, kind: input, shape index: {}]   ;;  %s473_s0 = inlined_call_operand.vmem [shape: f32[8,32], index: 0, kind: input, shape index: {}]   ;;  %s474_s5 = inlined_call_operand.vmem [shape: f32[32,4], index: 5, kind: input, shape index: {}]   ;;  %s475_s2 = inlined_call_operand.vmem [shape: f32[1,64], index: 2, kind: input, shape index: {}]   ;;  %s476_s4 = inlined_call_operand.vmem [shape: f32[1,32], index: 4, kind: input, shape index: {}]   ;;  %s477_s6 = inlined_call_operand.vmem [shape: f32[1,4], index: 6, kind: input, shape index: {}]   ;;  %s478_s7 = inlined_call_operand.vmem [shape: f32[8,4], index: 7, kind: output, shape index: {}]  }
   0x1   :  { %318 = vmatprep.subr.mxu0 %v361_v0  ;;  %v30_v1 = vld [vmem:[%s471_s1 + $0x18] sm:$0xff]  ;;  %v29_v2 = vld [vmem:[%s471_s1 + $0x10] sm:$0xff]  ;;  %326 = vmatprep.mubr.msk.f32.mxu0 %vm362_vm0, %v361_v0  ;;  %v28_v4 = vld [vmem:[%s471_s1 + $0x8] sm:$0xff]  ;;  %vm287_vm3 = vcmask 31744  }
   0x2   :  { %319 = vmatpush3.msra.mxu0 %v30_v1  ;;  %329 = vmatprep.subr.mxu1 %v361_v0  ;;  %v120_v3 = vld [vmem:[%s472_s3 + $0x38] sm:$0xff]  ;;  %v119_v5 = vld [vmem:[%s472_s3 + $0x30] sm:$0xff]  ;;  %v118_v6 = vld [vmem:[%s472_s3 + $0x28] sm:$0xff] }
   0x3   :  { %320 = vmatprep.subr.mxu0 %v361_v0  ;;  %330 = vmatpush3.msra.mxu1 %v120_v3  ;;  %v27_v7 = vld [vmem:[%s471_s1] sm:$0xff]  ;;  %v116_v10 = vld [vmem:[%s472_s3 + $0x18] sm:$0xff]  ;;  %v115_v11 = vld [vmem:[%s472_s3 + $0x10] sm:$0xff] }
   0x4   :  { %321 = vmatpush3.msra.mxu0 %v29_v2  ;;  %331 = vmatprep.subr.mxu1 %v361_v0  ;;  %v26_v8 = vld [vmem:[%s473_s0] sm:$0xff]  ;;  %v114_v12 = vld [vmem:[%s472_s3 + $0x8] sm:$0xff]  ;;  %v206_v14 = vld [vmem:[%s474_s5 + $0x18] sm:$0xff] }
   0x5   :  { %322 = vmatprep.subr.mxu0 %v361_v0  ;;  %332 = vmatpush3.msra.mxu1 %v119_v5  ;;  %v117_v9 = vld [vmem:[%s472_s3 + $0x20] sm:$0xff]  ;;  %v205_v20 = vld [vmem:[%s474_s5 + $0x10] sm:$0xff]  ;;  %v204_v21 = vld [vmem:[%s474_s5 + $0x8] sm:$0xff] }
   0x6   :  { %323 = vmatpush3.msra.mxu0 %v28_v4  ;;  %333 = vmatprep.subr.mxu1 %v361_v0  ;;  %v113_v13 = vld [vmem:[%s472_s3] sm:$0xff] }
   0x7   :  { %324 = vmatprep.subr.mxu0 %v361_v0  ;;  %334 = vmatpush3.msra.mxu1 %v118_v6  ;;  %v293_v15 = vld [vmem:[%s475_s2] ss:$0 sm:$0xff] }
   0x8   :  { %325 = vmatpush3.msra.mxu0 %v27_v7  ;;  %335 = vmatprep.subr.mxu1 %v361_v0  ;;  %v203_v22 = vld [vmem:[%s474_s5] sm:$0xff] }
   0x9   :  { %327 = vmatmul.mubr.msk.f32.vlgmr.msra.gmra.mxu0 %vm38_vm1, %v26_v8  ;;  %336 = vmatpush3.msra.mxu1 %v117_v9  ;;  %v295_v23 = vld [vmem:[%s476_s4] ss:$0 sm:$0xff] }
   0xa   :  { %337 = vmatprep.subr.mxu1 %v361_v0  ;;  %345 = vmatprep.mubr.msk.f32.mxu1 %vm362_vm0, %v361_v0  ;;  %v297_v28 = vld [vmem:[%s477_s6] ss:$0 sm:$0xff] }
   0xb   :  { %338 = vmatpush3.msra.mxu1 %v116_v10  ;;  %348 = vmatprep.subr.mxu0 %v361_v0 }
   0xc   :  { %339 = vmatprep.subr.mxu1 %v361_v0  ;;  %356 = vmatprep.mubr.msk.f32.mxu0 %vm362_vm0, %v361_v0 }
   0xd   :  { %340 = vmatpush3.msra.mxu1 %v115_v11  ;;  %349 = vmatpush3.msra.mxu0 %v206_v14 }
   0xe   :  { %341 = vmatprep.subr.mxu1 %v361_v0  ;;  %350 = vmatprep.subr.mxu0 %v361_v0 }
   0xf   :  { %342 = vmatpush3.msra.mxu1 %v114_v12  ;;  %351 = vmatpush3.msra.mxu0 %v205_v20 }
  0x10   :  { %343 = vmatprep.subr.mxu1 %v361_v0  ;;  %352 = vmatprep.subr.mxu0 %v361_v0 }
  0x11   :  { %344 = vmatpush3.msra.mxu1 %v113_v13  ;;  %353 = vmatpush3.msra.mxu0 %v204_v21 }
  0x12   :  { %354 = vmatprep.subr.mxu0 %v361_v0 }
  0x13   :  { %355 = vmatpush3.msra.mxu0 %v203_v22 }
  0xc9   :  { %v108_v16 = vpop.f32.mrf.mxu0 }
  0xca   :  { %v109_v17 = vadd.f32 %v293_v15, %v108_v16 }
  0xcb   :  { %v328_v18 = vpop.f32.mrf.mxu0 }
  0xcc   :  { %v112_v19 = vmax.f32 %v109_v17, 0.0 }
  0xce   :  { %346 = vmatmul.mubr.msk.f32.vlgmr.msra.gmra.mxu1 %vm128_vm2, %v112_v19 }
 0x18e   :  { %v198_v24 = vpop.f32.mrf.mxu1 }
 0x18f   :  { %v199_v25 = vadd.f32 %v295_v23, %v198_v24 }
 0x190   :  { %v347_v26 = vpop.f32.mrf.mxu1 }
 0x191   :  { %v202_v27 = vmax.f32 %v199_v25, 0.0 }
 0x193   :  { %357 = vmatmul.mubr.msk.f32.vlgmr.msra.gmra.mxu0 %vm38_vm1, %v202_v27 }
 0x253   :  { %v283_v29 = vpop.f32.mrf.mxu0 }
 0x254   :  { %v284_v30 = vadd.f32 %v297_v28, %v283_v29 }
 0x255   :  { %v358_v31 = vpop.f32.mrf.mxu0 }
 0x256   :  { %288 = vst.msk [vmem:[%s478_s7] sm:$0xff] %vm287_vm3, %v284_v30 }

</bundles_post_ra>
